<compile_context>
chip_gen: v6e
topology: v6e:2x2x1
jax: 0.10.0
libtpu: 0.0.40
codegen_flags: <defaults>
</compile_context>

<pallas_src>
import jax
import jax.numpy as jnp
from jax.experimental import pallas as pl
from jax.experimental.pallas import tpu as pltpu

PAD_OUT = 128    # lane-dense padded width of the final matmul (compute only)
TB_MAX = 2048    # max batch tile; sweep 1024/2048 in production, safe on v5e


def _round_up(n, m):
    return ((n + m - 1) // m) * m


def mlp_kernel(x_ref,
               w1_ref, b1_ref,
               w2_ref, b2_ref,
               w3_ref, b3_ref,
               w4_ref, b4_ref,
               o_ref):
    x = x_ref[...].astype(jnp.bfloat16)                              # (TB, D)

    # layer1 + relu
    h1 = jnp.dot(x, w1_ref[...], preferred_element_type=jnp.float32) + b1_ref[...]
    h1 = jnp.maximum(h1, 0.0).astype(jnp.bfloat16)

    # layer2 + relu
    h2 = jnp.dot(h1, w2_ref[...], preferred_element_type=jnp.float32) + b2_ref[...]
    h2 = jnp.maximum(h2, 0.0).astype(jnp.bfloat16)

    # layer3 + relu
    h3 = jnp.dot(h2, w3_ref[...], preferred_element_type=jnp.float32) + b3_ref[...]
    h3 = jnp.maximum(h3, 0.0).astype(jnp.bfloat16)

    # layer4 computed lane-dense (padded to 128 columns) + stable softmax.
    # Padded b4 lanes hold -1e30 (kept f32), so exp() kills them and the
    # softmax effectively runs over the 3 real classes only.
    logits = jnp.dot(h3, w4_ref[...], preferred_element_type=jnp.float32) + b4_ref[...]
    m = jnp.max(logits, axis=-1, keepdims=True)
    e = jnp.exp(logits - m)
    denom = jnp.sum(e, axis=-1, keepdims=True)
    probs = e * pl.reciprocal(denom, approx=True)
    # Store only the real classes: (TB, 3) f32 — tiny HBM writeback.
    o_ref[...] = probs[:, :o_ref.shape[-1]]


def _pick_tile(batch):
    tb = min(TB_MAX, _round_up(batch, 8))
    # v7x has 2 TensorCores and the "parallel" batch axis is how grid steps
    # get sharded across them: prefer >= 2 grid steps once the batch is big
    # enough that the extra ~0.35 us step overhead is negligible.
    if batch >= 256 and pl.cdiv(batch, tb) < 2:
        tb = _round_up(pl.cdiv(batch, 2), 8)
    return tb


def mlp_forward(x, params, *, tb=None):
    """x: (B, D) float32. params: list of 4 (w, b) pairs, w of shape (in, out)."""
    (w1, b1), (w2, b2), (w3, b3), (w4, b4) = params
    B, D = x.shape
    out_dim = w4.shape[1]

    if tb is None:
        tb = _pick_tile(B)
    n_blocks = pl.cdiv(B, tb)
    b_pad = n_blocks * tb
    if b_pad != B:  # ragged tail only: pad rows (garbage rows sliced off below)
        x = jnp.pad(x, ((0, b_pad - B), (0, 0)))

    # Lane-dense final layer for the MXU: pad w4 with zeros; pad b4 with a
    # large negative that STAYS f32 (added post-accumulation) so padded
    # logits vanish under exp without inf/NaN risk.
    w4p = jnp.zeros((w4.shape[0], PAD_OUT), jnp.float32).at[:, :out_dim].set(w4)
    b4p = jnp.full((1, PAD_OUT), -1e30, jnp.float32).at[:, :out_dim].set(b4)

    # bf16 weights for the MXU; biases stay f32.
    w1b, w2b, w3b, w4b = (w.astype(jnp.bfloat16) for w in (w1, w2, w3, w4p))

    def resident(shape):  # same block every grid step -> stays VMEM-resident
        return pl.BlockSpec(shape, lambda i: (0, 0))

    out = pl.pallas_call(
        mlp_kernel,
        out_shape=jax.ShapeDtypeStruct((b_pad, out_dim), jnp.float32),
        grid=(n_blocks,),
        in_specs=[
            pl.BlockSpec((tb, D), lambda i: (i, 0)),      # x, batch-tiled
            resident(w1b.shape), resident(b1.shape),
            resident(w2b.shape), resident(b2.shape),
            resident(w3b.shape), resident(b3.shape),
            resident(w4b.shape), resident(b4p.shape),
        ],
        out_specs=pl.BlockSpec((tb, out_dim), lambda i: (i, 0)),
        compiler_params=pltpu.CompilerParams(
            dimension_semantics=("parallel",)),
    )(x, w1b, b1, w2b, b2, w3b, b3, w4b, b4p)

    return out if b_pad == B else out[:B]


def init_linear(key, in_dim, out_dim):
    # Mimic PyTorch nn.Linear default init: U(-1/sqrt(in), 1/sqrt(in)).
    kw, kb = jax.random.split(key)
    bound = 1.0 / (in_dim ** 0.5)
    w = jax.random.uniform(kw, (in_dim, out_dim), jnp.float32, -bound, bound)
    b = jax.random.uniform(kb, (1, out_dim), jnp.float32, -bound, bound)
    return w, b


def mlp_reference(x, params):
    h = x
    for i, (w, b) in enumerate(params):
        h = h @ w + b
        if i < len(params) - 1:
            h = jnp.maximum(h, 0.0)
    return jax.nn.softmax(h, axis=-1)


if __name__ == "__main__":
    input_dim = 4   # iris feature dimension
    batch = 8

    key = jax.random.PRNGKey(0)
    kx, k1, k2, k3, k4 = jax.random.split(key, 5)

    x = jax.random.normal(kx, (batch, input_dim), jnp.float32)

    params = [
        init_linear(k1, input_dim, 50),
        init_linear(k2, 50, 30),
        init_linear(k3, 30, 20),
        init_linear(k4, 20, 3),
    ]

    out = jax.block_until_ready(mlp_forward(x, params))

    # Sanity: shape, softmax rows sum to ~1, close to f32 reference.
    assert out.shape == (batch, 3)
    assert jnp.allclose(jnp.sum(out, axis=-1), 1.0, atol=1e-2)
    ref = mlp_reference(x, params)
    assert jnp.max(jnp.abs(out - ref)) < 5e-2  # bf16 matmuls + approx reciprocal

    # Also exercise the multi-block / ragged-tail path (2 grid steps + pad+slice).
    xb = jax.random.normal(kx, (300, input_dim), jnp.float32)
    outb = jax.block_until_ready(mlp_forward(xb, params))
    assert outb.shape == (300, 3)
    refb = mlp_reference(xb, params)
    assert jnp.max(jnp.abs(outb - refb)) < 5e-2

    print("KERNEL_OK")
</pallas_src>

<mosaic_0001>
module attributes {stable_mosaic.version = 11 : i64} {
  func.func @mlp_kernel(%arg0: i32, %arg1: memref<8x4xf32, #tpu.memory_space<vmem>>, %arg2: memref<4x50xbf16, #tpu.memory_space<vmem>>, %arg3: memref<1x50xf32, #tpu.memory_space<vmem>>, %arg4: memref<50x30xbf16, #tpu.memory_space<vmem>>, %arg5: memref<1x30xf32, #tpu.memory_space<vmem>>, %arg6: memref<30x20xbf16, #tpu.memory_space<vmem>>, %arg7: memref<1x20xf32, #tpu.memory_space<vmem>>, %arg8: memref<20x128xbf16, #tpu.memory_space<vmem>>, %arg9: memref<1x128xf32, #tpu.memory_space<vmem>>, %arg10: memref<8x3xf32, #tpu.memory_space<vmem>>) attributes {dimension_semantics = [#tpu.dimension_semantics<parallel>], iteration_bounds = array<i64: 1>, scalar_prefetch = 0 : i64, scratch_operands = 0 : i64, tpu.core_type = #tpu.core_type<tc>, window_params = [{transform_indices = @transform_0, window_bounds = array<i64: 8, 4>}, {pipeline_mode = #tpu.pipeline_mode<synchronous>, transform_indices = @transform_1, window_bounds = array<i64: 4, 50>}, {pipeline_mode = #tpu.pipeline_mode<synchronous>, transform_indices = @transform_2, window_bounds = array<i64: 1, 50>}, {pipeline_mode = #tpu.pipeline_mode<synchronous>, transform_indices = @transform_3, window_bounds = array<i64: 50, 30>}, {pipeline_mode = #tpu.pipeline_mode<synchronous>, transform_indices = @transform_4, window_bounds = array<i64: 1, 30>}, {pipeline_mode = #tpu.pipeline_mode<synchronous>, transform_indices = @transform_5, window_bounds = array<i64: 30, 20>}, {pipeline_mode = #tpu.pipeline_mode<synchronous>, transform_indices = @transform_6, window_bounds = array<i64: 1, 20>}, {pipeline_mode = #tpu.pipeline_mode<synchronous>, transform_indices = @transform_7, window_bounds = array<i64: 20, 128>}, {pipeline_mode = #tpu.pipeline_mode<synchronous>, transform_indices = @transform_8, window_bounds = array<i64: 1, 128>}, {transform_indices = @transform_9, window_bounds = array<i64: 8, 3>}]} {
    %c0 = arith.constant 0 : index
    %c0_0 = arith.constant 0 : index
    %0 = vector.load %arg1[%c0, %c0_0] : memref<8x4xf32, #tpu.memory_space<vmem>>, vector<8x4xf32>
    %1 = arith.truncf %0 : vector<8x4xf32> to vector<8x4xbf16>
    %c0_1 = arith.constant 0 : index
    %c0_2 = arith.constant 0 : index
    %2 = vector.load %arg2[%c0_1, %c0_2] : memref<4x50xbf16, #tpu.memory_space<vmem>>, vector<4x50xbf16>
    %cst = arith.constant dense<0.000000e+00> : vector<8x50xf32>
    %3 = tpu.matmul %1, %2, %cst {dimension_numbers = #tpu.dot_dimension_numbers<[1], [0], [0], [1], [0, 0, 1, 1], [], []>} : vector<8x4xbf16>, vector<4x50xbf16>, vector<8x50xf32> -> vector<8x50xf32>
    %c0_3 = arith.constant 0 : index
    %c0_4 = arith.constant 0 : index
    %4 = vector.load %arg3[%c0_3, %c0_4] : memref<1x50xf32, #tpu.memory_space<vmem>>, vector<1x50xf32>
    %5 = vector.broadcast %4 : vector<1x50xf32> to vector<8x50xf32>
    %6 = arith.addf %3, %5 : vector<8x50xf32>
    %cst_5 = arith.constant 0.000000e+00 : f32
    %7 = vector.broadcast %cst_5 : f32 to vector<8x50xf32>
    %8 = arith.maximumf %6, %7 : vector<8x50xf32>
    %9 = arith.truncf %8 : vector<8x50xf32> to vector<8x50xbf16>
    %c0_6 = arith.constant 0 : index
    %c0_7 = arith.constant 0 : index
    %10 = vector.load %arg4[%c0_6, %c0_7] : memref<50x30xbf16, #tpu.memory_space<vmem>>, vector<50x30xbf16>
    %cst_8 = arith.constant dense<0.000000e+00> : vector<8x30xf32>
    %11 = tpu.matmul %9, %10, %cst_8 {dimension_numbers = #tpu.dot_dimension_numbers<[1], [0], [0], [1], [0, 0, 1, 1], [], []>} : vector<8x50xbf16>, vector<50x30xbf16>, vector<8x30xf32> -> vector<8x30xf32>
    %c0_9 = arith.constant 0 : index
    %c0_10 = arith.constant 0 : index
    %12 = vector.load %arg5[%c0_9, %c0_10] : memref<1x30xf32, #tpu.memory_space<vmem>>, vector<1x30xf32>
    %13 = vector.broadcast %12 : vector<1x30xf32> to vector<8x30xf32>
    %14 = arith.addf %11, %13 : vector<8x30xf32>
    %cst_11 = arith.constant 0.000000e+00 : f32
    %15 = vector.broadcast %cst_11 : f32 to vector<8x30xf32>
    %16 = arith.maximumf %14, %15 : vector<8x30xf32>
    %17 = arith.truncf %16 : vector<8x30xf32> to vector<8x30xbf16>
    %c0_12 = arith.constant 0 : index
    %c0_13 = arith.constant 0 : index
    %18 = vector.load %arg6[%c0_12, %c0_13] : memref<30x20xbf16, #tpu.memory_space<vmem>>, vector<30x20xbf16>
    %cst_14 = arith.constant dense<0.000000e+00> : vector<8x20xf32>
    %19 = tpu.matmul %17, %18, %cst_14 {dimension_numbers = #tpu.dot_dimension_numbers<[1], [0], [0], [1], [0, 0, 1, 1], [], []>} : vector<8x30xbf16>, vector<30x20xbf16>, vector<8x20xf32> -> vector<8x20xf32>
    %c0_15 = arith.constant 0 : index
    %c0_16 = arith.constant 0 : index
    %20 = vector.load %arg7[%c0_15, %c0_16] : memref<1x20xf32, #tpu.memory_space<vmem>>, vector<1x20xf32>
    %21 = vector.broadcast %20 : vector<1x20xf32> to vector<8x20xf32>
    %22 = arith.addf %19, %21 : vector<8x20xf32>
    %cst_17 = arith.constant 0.000000e+00 : f32
    %23 = vector.broadcast %cst_17 : f32 to vector<8x20xf32>
    %24 = arith.maximumf %22, %23 : vector<8x20xf32>
    %25 = arith.truncf %24 : vector<8x20xf32> to vector<8x20xbf16>
    %c0_18 = arith.constant 0 : index
    %c0_19 = arith.constant 0 : index
    %26 = vector.load %arg8[%c0_18, %c0_19] : memref<20x128xbf16, #tpu.memory_space<vmem>>, vector<20x128xbf16>
    %cst_20 = arith.constant dense<0.000000e+00> : vector<8x128xf32>
    %27 = tpu.matmul %25, %26, %cst_20 {dimension_numbers = #tpu.dot_dimension_numbers<[1], [0], [0], [1], [0, 0, 1, 1], [], []>} : vector<8x20xbf16>, vector<20x128xbf16>, vector<8x128xf32> -> vector<8x128xf32>
    %c0_21 = arith.constant 0 : index
    %c0_22 = arith.constant 0 : index
    %28 = vector.load %arg9[%c0_21, %c0_22] : memref<1x128xf32, #tpu.memory_space<vmem>>, vector<1x128xf32>
    %29 = vector.broadcast %28 : vector<1x128xf32> to vector<8x128xf32>
    %30 = arith.addf %27, %29 : vector<8x128xf32>
    %cst_23 = arith.constant dense<0xFF800000> : vector<8xf32>
    %31 = vector.multi_reduction <maximumf>, %30, %cst_23 [1] : vector<8x128xf32> to vector<8xf32>
    %32 = vector.shape_cast %31 : vector<8xf32> to vector<8x1xf32>
    %33 = vector.broadcast %32 : vector<8x1xf32> to vector<8x128xf32>
    %34 = arith.subf %30, %33 : vector<8x128xf32>
    %35 = math.exp %34 : vector<8x128xf32>
    %cst_24 = arith.constant dense<0.000000e+00> : vector<8xf32>
    %36 = vector.multi_reduction <add>, %35, %cst_24 [1] : vector<8x128xf32> to vector<8xf32>
    %37 = vector.shape_cast %36 : vector<8xf32> to vector<8x1xf32>
    %38 = tpu.reciprocal %37 {approx = true} : vector<8x1xf32> -> vector<8x1xf32>
    %39 = vector.broadcast %38 : vector<8x1xf32> to vector<8x128xf32>
    %40 = arith.mulf %35, %39 : vector<8x128xf32>
    %41 = vector.extract_strided_slice %40 {offsets = [0, 0], sizes = [8, 3], strides = [1, 1]} : vector<8x128xf32> to vector<8x3xf32>
    %c0_25 = arith.constant 0 : index
    %c0_26 = arith.constant 0 : index
    %42 = vector.load %arg10[%c0_25, %c0_26] : memref<8x3xf32, #tpu.memory_space<vmem>>, vector<8x3xf32>
    tpu.vector_store %arg10[%c0_25, %c0_26], %41 {strides = array<i32>} : memref<8x3xf32, #tpu.memory_space<vmem>>, vector<8x3xf32>,
    return
  }
  func.func @transform_0(%arg0: i32) -> (i32, i32) {
    %c0_i32 = arith.constant 0 : i32
    %c0_i32_0 = arith.constant 0 : i32
    return %arg0, %c0_i32 : i32, i32
  }
  func.func @transform_1(%arg0: i32) -> (i32, i32) {
    %c0_i32 = arith.constant 0 : i32
    %c0_i32_0 = arith.constant 0 : i32
    %c0_i32_1 = arith.constant 0 : i32
    return %c0_i32, %c0_i32_0 : i32, i32
  }
  func.func @transform_2(%arg0: i32) -> (i32, i32) {
    %c0_i32 = arith.constant 0 : i32
    %c0_i32_0 = arith.constant 0 : i32
    %c0_i32_1 = arith.constant 0 : i32
    return %c0_i32, %c0_i32_0 : i32, i32
  }
  func.func @transform_3(%arg0: i32) -> (i32, i32) {
    %c0_i32 = arith.constant 0 : i32
    %c0_i32_0 = arith.constant 0 : i32
    %c0_i32_1 = arith.constant 0 : i32
    return %c0_i32, %c0_i32_0 : i32, i32
  }
  func.func @transform_4(%arg0: i32) -> (i32, i32) {
    %c0_i32 = arith.constant 0 : i32
    %c0_i32_0 = arith.constant 0 : i32
    %c0_i32_1 = arith.constant 0 : i32
    return %c0_i32, %c0_i32_0 : i32, i32
  }
  func.func @transform_5(%arg0: i32) -> (i32, i32) {
    %c0_i32 = arith.constant 0 : i32
    %c0_i32_0 = arith.constant 0 : i32
    %c0_i32_1 = arith.constant 0 : i32
    return %c0_i32, %c0_i32_0 : i32, i32
  }
  func.func @transform_6(%arg0: i32) -> (i32, i32) {
    %c0_i32 = arith.constant 0 : i32
    %c0_i32_0 = arith.constant 0 : i32
    %c0_i32_1 = arith.constant 0 : i32
    return %c0_i32, %c0_i32_0 : i32, i32
  }
  func.func @transform_7(%arg0: i32) -> (i32, i32) {
    %c0_i32 = arith.constant 0 : i32
    %c0_i32_0 = arith.constant 0 : i32
    %c0_i32_1 = arith.constant 0 : i32
    return %c0_i32, %c0_i32_0 : i32, i32
  }
  func.func @transform_8(%arg0: i32) -> (i32, i32) {
    %c0_i32 = arith.constant 0 : i32
    %c0_i32_0 = arith.constant 0 : i32
    %c0_i32_1 = arith.constant 0 : i32
    return %c0_i32, %c0_i32_0 : i32, i32
  }
  func.func @transform_9(%arg0: i32) -> (i32, i32) {
    %c0_i32 = arith.constant 0 : i32
    %c0_i32_0 = arith.constant 0 : i32
    return %arg0, %c0_i32 : i32, i32
  }
}

</mosaic_0001>

<bundles_post_ra>
// kernel: tpu_custom_call.1
= control target key start
LH: loop header
LB: loop body
LE: loop exit
PB: predicated region body
PF: predicated region fallthrough
CT: control target
= control target key end

     0   :  { %vm47_vm0 = vcmask 1041408   ;;  %v408_v0 = vmov 0.0   ;;  %vm409_vm1 = vmmov 0   ;;  %vm132_vm2 = vcmask 1040384   ;;  %s511_s1 = inlined_call_operand.vmem [shape: bf16[4,50], index: 1, kind: input, shape index: {}]   ;;  %s512_s7 = inlined_call_operand.vmem [shape: bf16[20,128], index: 7, kind: input, shape index: {}]   ;;  %s513_s0 = inlined_call_operand.vmem [shape: f32[8,4], index: 0, kind: input, shape index: {}]   ;;  %s514_s3 = inlined_call_operand.vmem [shape: bf16[50,30], index: 3, kind: input, shape index: {}]   ;;  %s515_s5 = inlined_call_operand.vmem [shape: bf16[30,20], index: 5, kind: input, shape index: {}]   ;;  %s516_s2 = inlined_call_operand.vmem [shape: f32[1,50], index: 2, kind: input, shape index: {}]   ;;  %s517_s4 = inlined_call_operand.vmem [shape: f32[1,30], index: 4, kind: input, shape index: {}]   ;;  %s518_s6 = inlined_call_operand.vmem [shape: f32[1,20], index: 6, kind: input, shape index: {}]   ;;  %s519_s8 = inlined_call_operand.vmem [shape: f32[1,128], index: 8, kind: input, shape index: {}]   ;;  %s520_s9 = inlined_call_operand.vmem [shape: f32[8,3], index: 9, kind: output, shape index: {}]  }
   0x1   :  { %360 = vmatprep.subr.bf16.mxu0 %v408_v0  ;;  %v35_v1 = vld [vmem:[%s511_s1] sm:$0x3]  ;;  %362 = vmatprep.mubr.msk.bf16.mxu0 %vm409_vm1, %v408_v0  ;;  %vm43_vm3 = vcmask 31744   ;;  %v397_v5 = vld [vmem:[%s514_s3 + $0x18] ss:$0 sps:$4 sm:$0x11]  }
   0x2   :  { %v33_v2 = vld [vmem:[%s513_s0] sm:$0xff]  ;;  %v49_v3 = vsel %vm47_vm0, %v35_v1, 0  ;;  %366 = vmatprep.subr.bf16.mxu1 %v408_v0  ;;  %374 = vmatprep.mubr.msk.bf16.mxu1 %vm409_vm1, %v408_v0  ;;  %v134_v6 = vsel %vm132_vm2, %v397_v5, 0  ;;  %v398_v7 = vld [vmem:[%s514_s3 + $0x10] sm:$0xff]   ;;  %v399_v8 = vld [vmem:[%s514_s3 + $0x8] sm:$0xff]   ;;  %vm204_vm4 = vcmask 1046528  }
   0x3   :  { %v34_v4 = vpack.c.bf16 %v33_v2, %v33_v2  ;;  %361 = vmatpush3.bf16.msra.mxu0 %v49_v3  ;;  %367 = vmatpush3.bf16.msra.mxu1 %v134_v6  ;;  %v400_v9 = vld [vmem:[%s514_s3] sm:$0xff]   ;;  %v401_v10 = vld [vmem:[%s515_s5 + $0x8] sm:$0x7f]   ;;  %vm128_vm5 = vcmask 408576   ;;  %vm200_vm6 = vcmask 244736   ;;  %vm269_vm7 = vcmask 162816  }
   0x4   :  { %378 = vmatprep.subr.bf16.mxu0 %v408_v0  ;;  %368 = vmatprep.subr.bf16.mxu1 %v408_v0  ;;  %v206_v11 = vsel %vm204_vm4, %v401_v10, 0  ;;  %v331_v12 = vld [vmem:[%s516_s2] ss:$0 sm:$0xff]  ;;  %v396_v23 = vld [vmem:[%s512_s7 + $0x8] ss:$0 sps:$4 sm:$0x33]  }
   0x5   :  { %v402_v20 = vld [vmem:[%s515_s5] sm:$0xff]   ;;  %v274_v28 = vsel %vm47_vm0, %v396_v23, 0  ;;  %vm325_vm8 = vcmask 23552  }
   0x6   :  { %363 = vmatmul.mubr.msk.bf16.vlgmr.msra.gmra.mxu0 %vm43_vm3, %v34_v4  ;;  %v333_v21 = vld [vmem:[%s517_s4] ss:$0 sm:$0xff] }
   0x7   :  { %382 = vmatprep.mubr.msk.bf16.mxu0 %vm409_vm1, %v408_v0  ;;  %369 = vmatpush3.bf16.msra.mxu1 %v398_v7  ;;  %v403_v31 = vld [vmem:[%s512_s7] sm:$0xff]  }
   0x8   :  { %370 = vmatprep.subr.bf16.mxu1 %v408_v0  ;;  %379 = vmatpush3.bf16.msra.mxu0 %v206_v11  ;;  %v339_v32 = vld [vmem:[%s518_s6] ss:$0 sm:$0xff] }
   0x9   :  { %380 = vmatprep.subr.bf16.mxu0 %v408_v0  ;;  %v343_v40 = vld [vmem:[%s519_s8] ss:$0 sm:$0xff] }
   0xb   :  { %371 = vmatpush3.bf16.msra.mxu1 %v399_v8 }
   0xc   :  { %372 = vmatprep.subr.bf16.mxu1 %v408_v0  ;;  %381 = vmatpush3.bf16.msra.mxu0 %v402_v20 }
   0xd   :  { %386 = vmatprep.subr.bf16.mxu0 %v408_v0 }
   0xf   :  { %373 = vmatpush3.bf16.msra.mxu1 %v400_v9 }
  0xc6   :  { %v85_v13 = vpop.f32.mrf.mxu0 }
  0xc7   :  { %v86_v14 = vadd.f32 %v331_v12, %v85_v13 }
  0xc8   :  { %v364_v15 = vpop.f32.mrf.mxu0 }
  0xc9   :  { %v91_v16 = vmax.f32 %v86_v14, 0.0 }
  0xca   :  { %v88_v17 = vpop.f32.mrf.mxu0 }
  0xcb   :  { %v92_v18 = vpack.c.bf16 %v91_v16, %v91_v16 }
  0xcc   :  { %v365_v19 = vpop.f32.mrf.mxu0 }
  0xcd   :  { %375 = vmatmul.mubr.msk.bf16.vlgmr.msra.gmra.mxu1 %vm128_vm5, %v92_v18 }
 0x18d   :  { %v170_v22 = vpop.f32.mrf.mxu1 }
 0x18e   :  { %v171_v24 = vadd.f32 %v333_v21, %v170_v22 }
 0x18f   :  { %v376_v25 = vpop.f32.mrf.mxu1 }
 0x190   :  { %v176_v26 = vmax.f32 %v171_v24, 0.0 }
 0x191   :  { %v173_v27 = vpop.f32.mrf.mxu1 }
 0x192   :  { %v177_v29 = vpack.c.bf16 %v176_v26, %v176_v26 }
 0x193   :  { %v377_v30 = vpop.f32.mrf.mxu1 }
 0x194   :  { %383 = vmatmul.mubr.msk.bf16.vlgmr.msra.gmra.mxu0 %vm200_vm6, %v177_v29 }
 0x195   :  { %387 = vmatpush3.bf16.msra.mxu0 %v274_v28  ;;  %390 = vmatprep.mubr.msk.bf16.mxu0 %vm409_vm1, %v408_v0 }
 0x196   :  { %388 = vmatprep.subr.bf16.mxu0 %v408_v0 }
 0x199   :  { %389 = vmatpush3.bf16.msra.mxu0 %v403_v31 }
 0x254   :  { %v242_v33 = vpop.f32.mrf.mxu0 }
 0x255   :  { %v243_v34 = vadd.f32 %v339_v32, %v242_v33 }
 0x256   :  { %v384_v35 = vpop.f32.mrf.mxu0 }
 0x257   :  { %v248_v36 = vmax.f32 %v243_v34, 0.0 }
 0x258   :  { %v245_v37 = vpop.f32.mrf.mxu0 }
 0x259   :  { %v249_v38 = vpack.c.bf16 %v248_v36, %v248_v36 }
 0x25a   :  { %v385_v39 = vpop.f32.mrf.mxu0 }
 0x25b   :  { %391 = vmatmul.mubr.msk.bf16.vlgmr.msra.gmra.mxu0 %vm269_vm7, %v249_v38 }
 0x31b   :  { %v310_v41 = vpop.f32.mrf.mxu0 }
 0x31c   :  { %v311_v42 = vadd.f32 %v343_v40, %v310_v41 }
 0x31d   :  { %v392_v43 = vpop.f32.mrf.mxu0 }
 0x31e   :  { %316 = vmax.xlane.f32.xlu0 %v311_v42 }
 0x31f   :  { %v313_v44 = vpop.f32.mrf.mxu0 }
 0x321   :  { %v393_v45 = vpop.f32.mrf.mxu0 }
 0x3a7   :  { %v317_v46 = vpop.xlane.xlu0 %316 }
 0x3a8   :  { %v318_v47 = vsub.f32 %v311_v42, %v317_v46 }
 0x3aa   :  { %v319_v48 = vmul.f32 1.442695, %v318_v47 }
 0x3ac   :  { %404 = vpow2.f32 %v319_v48 }
 0x3b9   :  { %v405_v49 = vpop.eup %404 }
 0x3ba   :  { %321 = vadd.xlane.f32.xlu0 %v405_v49 }
 0x443   :  { %v322_v50 = vpop.xlane.xlu0 %321 }
 0x444   :  { %406 = vrcp.f32 %v322_v50 }
 0x451   :  { %v407_v51 = vpop.eup %406 }
 0x452   :  { %v324_v52 = vmul.f32 %v407_v51, %v405_v49 }
 0x454   :  { %326 = vst.msk [vmem:[%s520_s9] sm:$0xff] %vm325_vm8, %v324_v52 }

</bundles_post_ra>
